<compile_context>
chip_gen: v6e
topology: v6e:2x2x1
jax: 0.10.0
libtpu: 0.0.40
codegen_flags: <defaults>
</compile_context>

<pallas_src>
import functools

import jax
import jax.numpy as jnp
from jax import lax
from jax.experimental import pallas as pl
from jax.experimental.pallas import tpu as pltpu


def lstm_kernel(x_ref, wih_t_ref, whh_pad_ref, bias_ref, wlin_pad_ref,
                blin_ref, out_ref, *, seq_len, hidden):
    H = hidden
    G = 4 * H  # lane-dense gate row width (i|f|g|o)

    # Input-to-hidden contribution for ALL timesteps in one MXU matmul:
    #   (T, input_size) @ (input_size, 4H) + (1, 4H) -> (T, 4H)
    gx = (jnp.dot(x_ref[...], wih_t_ref[...],
                  preferred_element_type=jnp.float32)
          + bias_ref[...])

    # whh_pad is (4H, 4H) with rows [H:] zero, so a full-width h (garbage in
    # lanes [H:]) still produces the exact (1, 4H) hidden-to-hidden term.
    whh = whh_pad_ref[...]

    # h_0, c_0 = 0 (matches torch.zeros hidden_cell). Carried in vregs.
    h = jnp.zeros((1, G), jnp.float32)
    c = jnp.zeros((1, G), jnp.float32)

    hs = []
    for t in range(seq_len):  # fully unrolled: static, small trip count
        # (1, 4H) gate pre-activations, gate order i, f, g, o.
        g = gx[t:t + 1, :] + jnp.dot(h, whh,
                                     preferred_element_type=jnp.float32)

        # Full-width EUP calls; gates aligned into lanes [0:H] via XLU rolls
        # (no sub-128-lane slicing on the critical path).
        s = jax.nn.sigmoid(g)                     # i, f, o live here
        u = jnp.tanh(g)                           # g-gate lives here
        i_g = s                                   # lanes [0:H]  = i
        f_g = pltpu.roll(s, shift=3 * H, axis=1)  # lanes [0:H] <- s[H:2H]  = f
        g_g = pltpu.roll(u, shift=2 * H, axis=1)  # lanes [0:H] <- u[2H:3H] = g
        o_g = pltpu.roll(s, shift=1 * H, axis=1)  # lanes [0:H] <- s[3H:4H] = o

        # Valid only in lanes [0:H]; garbage lanes stay bounded (products of
        # sigmoids/tanhs) and are annihilated by the zero rows of whh/wlin.
        c = f_g * c + i_g * g_g
        h = o_g * jnp.tanh(c)
        hs.append(h)

    # Stack all h_t into a lane-dense (T, 4H) slab held in vregs.
    hs_all = jnp.concatenate(hs, axis=0)

    # Final projection + sigmoid, written lane-dense (padded output columns
    # hold sigmoid(0)=0.5 and are sliced off in the wrapper).
    logits = (jnp.dot(hs_all, wlin_pad_ref[...],
                      preferred_element_type=jnp.float32)
              + blin_ref[...])
    out_ref[...] = jax.nn.sigmoid(logits)


def lstm_forward(x, w_ih, w_hh, b_ih, b_hh, w_lin, b_lin, *, out_lanes=128):
    """x: (T, input_size). Weights follow PyTorch nn.LSTM / nn.Linear shapes."""
    T, input_size = x.shape
    H = w_hh.shape[1]
    G = 4 * H
    assert T >= 1
    assert w_ih.shape == (G, input_size)
    assert w_hh.shape == (G, H)
    out_size = w_lin.shape[0]
    OUT = max(out_lanes, out_size)  # lane-dense output width

    f32 = jnp.float32
    # Pre-transposed / zero-padded weights (plain-JAX glue, host side).
    wih_t = jnp.asarray(w_ih, f32).T                                  # (in, 4H)
    whh_pad = jnp.zeros((G, G), f32).at[:H, :].set(jnp.asarray(w_hh, f32).T)
    bias = jnp.asarray(b_ih + b_hh, f32)[None, :]                     # (1, 4H)
    wlin_pad = jnp.zeros((G, OUT), f32).at[:H, :out_size].set(
        jnp.asarray(w_lin, f32).T)                                    # (4H, OUT)
    blin_pad = jnp.zeros((1, OUT), f32).at[:, :out_size].set(
        jnp.asarray(b_lin, f32)[None, :])                             # (1, OUT)

    kernel = functools.partial(lstm_kernel, seq_len=T, hidden=H)
    vmem = pl.BlockSpec(memory_space=pltpu.MemorySpace.VMEM)

    out_pad = pl.pallas_call(
        kernel,
        out_shape=jax.ShapeDtypeStruct((T, OUT), jnp.float32),
        in_specs=[vmem] * 6,
        out_specs=vmem,
    )(x.astype(f32), wih_t, whh_pad, bias, wlin_pad, blin_pad)

    return out_pad[:, :out_size]


def lstm_ref(x, w_ih, w_hh, b_ih, b_hh, w_lin, b_lin):
    """Pure-JAX reference matching PyTorch nn.LSTM (gate order i,f,g,o)."""
    H = w_hh.shape[1]

    def step(carry, xt):
        h, c = carry
        g = w_ih @ xt + b_ih + w_hh @ h + b_hh
        i = jax.nn.sigmoid(g[0 * H:1 * H])
        f = jax.nn.sigmoid(g[1 * H:2 * H])
        gg = jnp.tanh(g[2 * H:3 * H])
        o = jax.nn.sigmoid(g[3 * H:4 * H])
        c = f * c + i * gg
        h = o * jnp.tanh(c)
        return (h, c), h

    (_, _), hs = lax.scan(step, (jnp.zeros(H), jnp.zeros(H)), x)
    return jax.nn.sigmoid(hs @ w_lin.T + b_lin)


if __name__ == "__main__":
    # Small shapes consistent with the module's forward:
    #   N (= seq_len after .view) = 8, input_size = 16, hidden = 32, output = 1
    seq_len, input_size, hidden, out_size = 8, 16, 32, 1

    key = jax.random.PRNGKey(0)
    k = jax.random.split(key, 8)
    bound = 1.0 / jnp.sqrt(hidden)  # PyTorch-style uniform init bound

    x = jax.random.normal(k[0], (seq_len, input_size), jnp.float32)
    w_ih = jax.random.uniform(k[1], (4 * hidden, input_size), jnp.float32, -bound, bound)
    w_hh = jax.random.uniform(k[2], (4 * hidden, hidden), jnp.float32, -bound, bound)
    b_ih = jax.random.uniform(k[3], (4 * hidden,), jnp.float32, -bound, bound)
    b_hh = jax.random.uniform(k[4], (4 * hidden,), jnp.float32, -bound, bound)
    w_lin = jax.random.uniform(k[5], (out_size, hidden), jnp.float32, -bound, bound)
    b_lin = jax.random.uniform(k[6], (out_size,), jnp.float32, -bound, bound)

    out = lstm_forward(x, w_ih, w_hh, b_ih, b_hh, w_lin, b_lin)
    out = jax.block_until_ready(out)

    ref = lstm_ref(x, w_ih, w_hh, b_ih, b_hh, w_lin, b_lin)
    assert out.shape == (seq_len, out_size)
    assert jnp.max(jnp.abs(out - ref)) < 1e-5, "mismatch vs pure-JAX reference"

    print("KERNEL_OK")
</pallas_src>

<mosaic_0001>
module attributes {stable_mosaic.version = 11 : i64} {
  func.func @lstm_kernel(%arg0: memref<8x16xf32, #tpu.memory_space<vmem>>, %arg1: memref<16x128xf32, #tpu.memory_space<vmem>>, %arg2: memref<128x128xf32, #tpu.memory_space<vmem>>, %arg3: memref<1x128xf32, #tpu.memory_space<vmem>>, %arg4: memref<128x128xf32, #tpu.memory_space<vmem>>, %arg5: memref<1x128xf32, #tpu.memory_space<vmem>>, %arg6: memref<8x128xf32, #tpu.memory_space<vmem>>) attributes {dimension_semantics = [], scalar_prefetch = 0 : i64, scratch_operands = 0 : i64, tpu.core_type = #tpu.core_type<tc>} {
    %c0 = arith.constant 0 : index
    %c0_0 = arith.constant 0 : index
    %0 = vector.load %arg0[%c0, %c0_0] : memref<8x16xf32, #tpu.memory_space<vmem>>, vector<8x16xf32>
    %c0_1 = arith.constant 0 : index
    %c0_2 = arith.constant 0 : index
    %1 = vector.load %arg1[%c0_1, %c0_2] : memref<16x128xf32, #tpu.memory_space<vmem>>, vector<16x128xf32>
    %cst = arith.constant dense<0.000000e+00> : vector<8x128xf32>
    %2 = tpu.matmul %0, %1, %cst {dimension_numbers = #tpu.dot_dimension_numbers<[1], [0], [0], [1], [0, 0, 1, 1], [], []>} : vector<8x16xf32>, vector<16x128xf32>, vector<8x128xf32> -> vector<8x128xf32>
    %c0_3 = arith.constant 0 : index
    %c0_4 = arith.constant 0 : index
    %3 = vector.load %arg3[%c0_3, %c0_4] : memref<1x128xf32, #tpu.memory_space<vmem>>, vector<1x128xf32>
    %4 = vector.broadcast %3 : vector<1x128xf32> to vector<8x128xf32>
    %5 = arith.addf %2, %4 : vector<8x128xf32>
    %c0_5 = arith.constant 0 : index
    %c0_6 = arith.constant 0 : index
    %6 = vector.load %arg2[%c0_5, %c0_6] : memref<128x128xf32, #tpu.memory_space<vmem>>, vector<128x128xf32>
    %cst_7 = arith.constant 0.000000e+00 : f32
    %7 = vector.broadcast %cst_7 : f32 to vector<1x128xf32>
    %cst_8 = arith.constant 0.000000e+00 : f32
    %8 = vector.broadcast %cst_8 : f32 to vector<1x128xf32>
    %9 = vector.extract_strided_slice %5 {offsets = [0, 0], sizes = [1, 128], strides = [1, 1]} : vector<8x128xf32> to vector<1x128xf32>
    %cst_9 = arith.constant dense<0.000000e+00> : vector<1x128xf32>
    %10 = tpu.matmul %7, %6, %cst_9 {dimension_numbers = #tpu.dot_dimension_numbers<[1], [0], [0], [1], [0, 0, 1, 1], [], []>} : vector<1x128xf32>, vector<128x128xf32>, vector<1x128xf32> -> vector<1x128xf32>
    %11 = arith.addf %9, %10 : vector<1x128xf32>
    %12 = arith.negf %11 : vector<1x128xf32>
    %13 = math.exp %12 : vector<1x128xf32>
    %cst_10 = arith.constant 1.000000e+00 : f32
    %14 = vector.broadcast %cst_10 : f32 to vector<1x128xf32>
    %15 = arith.addf %14, %13 : vector<1x128xf32>
    %16 = arith.divf %14, %15 : vector<1x128xf32>
    %17 = math.tanh %11 : vector<1x128xf32>
    %c96_i32 = arith.constant 96 : i32
    %18 = tpu.dynamic_rotate %16 by %c96_i32 dim 1 : vector<1x128xf32>, i32 -> vector<1x128xf32>
    %c64_i32 = arith.constant 64 : i32
    %19 = tpu.dynamic_rotate %17 by %c64_i32 dim 1 : vector<1x128xf32>, i32 -> vector<1x128xf32>
    %c32_i32 = arith.constant 32 : i32
    %20 = tpu.dynamic_rotate %16 by %c32_i32 dim 1 : vector<1x128xf32>, i32 -> vector<1x128xf32>
    %21 = arith.mulf %18, %8 : vector<1x128xf32>
    %22 = arith.mulf %16, %19 : vector<1x128xf32>
    %23 = arith.addf %21, %22 : vector<1x128xf32>
    %24 = math.tanh %23 : vector<1x128xf32>
    %25 = arith.mulf %20, %24 : vector<1x128xf32>
    %26 = vector.extract_strided_slice %5 {offsets = [1, 0], sizes = [1, 128], strides = [1, 1]} : vector<8x128xf32> to vector<1x128xf32>
    %cst_11 = arith.constant dense<0.000000e+00> : vector<1x128xf32>
    %27 = tpu.matmul %25, %6, %cst_11 {dimension_numbers = #tpu.dot_dimension_numbers<[1], [0], [0], [1], [0, 0, 1, 1], [], []>} : vector<1x128xf32>, vector<128x128xf32>, vector<1x128xf32> -> vector<1x128xf32>
    %28 = arith.addf %26, %27 : vector<1x128xf32>
    %29 = arith.negf %28 : vector<1x128xf32>
    %30 = math.exp %29 : vector<1x128xf32>
    %cst_12 = arith.constant 1.000000e+00 : f32
    %31 = vector.broadcast %cst_12 : f32 to vector<1x128xf32>
    %32 = arith.addf %31, %30 : vector<1x128xf32>
    %33 = arith.divf %31, %32 : vector<1x128xf32>
    %34 = math.tanh %28 : vector<1x128xf32>
    %c96_i32_13 = arith.constant 96 : i32
    %35 = tpu.dynamic_rotate %33 by %c96_i32_13 dim 1 : vector<1x128xf32>, i32 -> vector<1x128xf32>
    %c64_i32_14 = arith.constant 64 : i32
    %36 = tpu.dynamic_rotate %34 by %c64_i32_14 dim 1 : vector<1x128xf32>, i32 -> vector<1x128xf32>
    %c32_i32_15 = arith.constant 32 : i32
    %37 = tpu.dynamic_rotate %33 by %c32_i32_15 dim 1 : vector<1x128xf32>, i32 -> vector<1x128xf32>
    %38 = arith.mulf %35, %23 : vector<1x128xf32>
    %39 = arith.mulf %33, %36 : vector<1x128xf32>
    %40 = arith.addf %38, %39 : vector<1x128xf32>
    %41 = math.tanh %40 : vector<1x128xf32>
    %42 = arith.mulf %37, %41 : vector<1x128xf32>
    %43 = vector.extract_strided_slice %5 {offsets = [2, 0], sizes = [1, 128], strides = [1, 1]} : vector<8x128xf32> to vector<1x128xf32>
    %cst_16 = arith.constant dense<0.000000e+00> : vector<1x128xf32>
    %44 = tpu.matmul %42, %6, %cst_16 {dimension_numbers = #tpu.dot_dimension_numbers<[1], [0], [0], [1], [0, 0, 1, 1], [], []>} : vector<1x128xf32>, vector<128x128xf32>, vector<1x128xf32> -> vector<1x128xf32>
    %45 = arith.addf %43, %44 : vector<1x128xf32>
    %46 = arith.negf %45 : vector<1x128xf32>
    %47 = math.exp %46 : vector<1x128xf32>
    %cst_17 = arith.constant 1.000000e+00 : f32
    %48 = vector.broadcast %cst_17 : f32 to vector<1x128xf32>
    %49 = arith.addf %48, %47 : vector<1x128xf32>
    %50 = arith.divf %48, %49 : vector<1x128xf32>
    %51 = math.tanh %45 : vector<1x128xf32>
    %c96_i32_18 = arith.constant 96 : i32
    %52 = tpu.dynamic_rotate %50 by %c96_i32_18 dim 1 : vector<1x128xf32>, i32 -> vector<1x128xf32>
    %c64_i32_19 = arith.constant 64 : i32
    %53 = tpu.dynamic_rotate %51 by %c64_i32_19 dim 1 : vector<1x128xf32>, i32 -> vector<1x128xf32>
    %c32_i32_20 = arith.constant 32 : i32
    %54 = tpu.dynamic_rotate %50 by %c32_i32_20 dim 1 : vector<1x128xf32>, i32 -> vector<1x128xf32>
    %55 = arith.mulf %52, %40 : vector<1x128xf32>
    %56 = arith.mulf %50, %53 : vector<1x128xf32>
    %57 = arith.addf %55, %56 : vector<1x128xf32>
    %58 = math.tanh %57 : vector<1x128xf32>
    %59 = arith.mulf %54, %58 : vector<1x128xf32>
    %60 = vector.extract_strided_slice %5 {offsets = [3, 0], sizes = [1, 128], strides = [1, 1]} : vector<8x128xf32> to vector<1x128xf32>
    %cst_21 = arith.constant dense<0.000000e+00> : vector<1x128xf32>
    %61 = tpu.matmul %59, %6, %cst_21 {dimension_numbers = #tpu.dot_dimension_numbers<[1], [0], [0], [1], [0, 0, 1, 1], [], []>} : vector<1x128xf32>, vector<128x128xf32>, vector<1x128xf32> -> vector<1x128xf32>
    %62 = arith.addf %60, %61 : vector<1x128xf32>
    %63 = arith.negf %62 : vector<1x128xf32>
    %64 = math.exp %63 : vector<1x128xf32>
    %cst_22 = arith.constant 1.000000e+00 : f32
    %65 = vector.broadcast %cst_22 : f32 to vector<1x128xf32>
    %66 = arith.addf %65, %64 : vector<1x128xf32>
    %67 = arith.divf %65, %66 : vector<1x128xf32>
    %68 = math.tanh %62 : vector<1x128xf32>
    %c96_i32_23 = arith.constant 96 : i32
    %69 = tpu.dynamic_rotate %67 by %c96_i32_23 dim 1 : vector<1x128xf32>, i32 -> vector<1x128xf32>
    %c64_i32_24 = arith.constant 64 : i32
    %70 = tpu.dynamic_rotate %68 by %c64_i32_24 dim 1 : vector<1x128xf32>, i32 -> vector<1x128xf32>
    %c32_i32_25 = arith.constant 32 : i32
    %71 = tpu.dynamic_rotate %67 by %c32_i32_25 dim 1 : vector<1x128xf32>, i32 -> vector<1x128xf32>
    %72 = arith.mulf %69, %57 : vector<1x128xf32>
    %73 = arith.mulf %67, %70 : vector<1x128xf32>
    %74 = arith.addf %72, %73 : vector<1x128xf32>
    %75 = math.tanh %74 : vector<1x128xf32>
    %76 = arith.mulf %71, %75 : vector<1x128xf32>
    %77 = vector.extract_strided_slice %5 {offsets = [4, 0], sizes = [1, 128], strides = [1, 1]} : vector<8x128xf32> to vector<1x128xf32>
    %cst_26 = arith.constant dense<0.000000e+00> : vector<1x128xf32>
    %78 = tpu.matmul %76, %6, %cst_26 {dimension_numbers = #tpu.dot_dimension_numbers<[1], [0], [0], [1], [0, 0, 1, 1], [], []>} : vector<1x128xf32>, vector<128x128xf32>, vector<1x128xf32> -> vector<1x128xf32>
    %79 = arith.addf %77, %78 : vector<1x128xf32>
    %80 = arith.negf %79 : vector<1x128xf32>
    %81 = math.exp %80 : vector<1x128xf32>
    %cst_27 = arith.constant 1.000000e+00 : f32
    %82 = vector.broadcast %cst_27 : f32 to vector<1x128xf32>
    %83 = arith.addf %82, %81 : vector<1x128xf32>
    %84 = arith.divf %82, %83 : vector<1x128xf32>
    %85 = math.tanh %79 : vector<1x128xf32>
    %c96_i32_28 = arith.constant 96 : i32
    %86 = tpu.dynamic_rotate %84 by %c96_i32_28 dim 1 : vector<1x128xf32>, i32 -> vector<1x128xf32>
    %c64_i32_29 = arith.constant 64 : i32
    %87 = tpu.dynamic_rotate %85 by %c64_i32_29 dim 1 : vector<1x128xf32>, i32 -> vector<1x128xf32>
    %c32_i32_30 = arith.constant 32 : i32
    %88 = tpu.dynamic_rotate %84 by %c32_i32_30 dim 1 : vector<1x128xf32>, i32 -> vector<1x128xf32>
    %89 = arith.mulf %86, %74 : vector<1x128xf32>
    %90 = arith.mulf %84, %87 : vector<1x128xf32>
    %91 = arith.addf %89, %90 : vector<1x128xf32>
    %92 = math.tanh %91 : vector<1x128xf32>
    %93 = arith.mulf %88, %92 : vector<1x128xf32>
    %94 = vector.extract_strided_slice %5 {offsets = [5, 0], sizes = [1, 128], strides = [1, 1]} : vector<8x128xf32> to vector<1x128xf32>
    %cst_31 = arith.constant dense<0.000000e+00> : vector<1x128xf32>
    %95 = tpu.matmul %93, %6, %cst_31 {dimension_numbers = #tpu.dot_dimension_numbers<[1], [0], [0], [1], [0, 0, 1, 1], [], []>} : vector<1x128xf32>, vector<128x128xf32>, vector<1x128xf32> -> vector<1x128xf32>
    %96 = arith.addf %94, %95 : vector<1x128xf32>
    %97 = arith.negf %96 : vector<1x128xf32>
    %98 = math.exp %97 : vector<1x128xf32>
    %cst_32 = arith.constant 1.000000e+00 : f32
    %99 = vector.broadcast %cst_32 : f32 to vector<1x128xf32>
    %100 = arith.addf %99, %98 : vector<1x128xf32>
    %101 = arith.divf %99, %100 : vector<1x128xf32>
    %102 = math.tanh %96 : vector<1x128xf32>
    %c96_i32_33 = arith.constant 96 : i32
    %103 = tpu.dynamic_rotate %101 by %c96_i32_33 dim 1 : vector<1x128xf32>, i32 -> vector<1x128xf32>
    %c64_i32_34 = arith.constant 64 : i32
    %104 = tpu.dynamic_rotate %102 by %c64_i32_34 dim 1 : vector<1x128xf32>, i32 -> vector<1x128xf32>
    %c32_i32_35 = arith.constant 32 : i32
    %105 = tpu.dynamic_rotate %101 by %c32_i32_35 dim 1 : vector<1x128xf32>, i32 -> vector<1x128xf32>
    %106 = arith.mulf %103, %91 : vector<1x128xf32>
    %107 = arith.mulf %101, %104 : vector<1x128xf32>
    %108 = arith.addf %106, %107 : vector<1x128xf32>
    %109 = math.tanh %108 : vector<1x128xf32>
    %110 = arith.mulf %105, %109 : vector<1x128xf32>
    %111 = vector.extract_strided_slice %5 {offsets = [6, 0], sizes = [1, 128], strides = [1, 1]} : vector<8x128xf32> to vector<1x128xf32>
    %cst_36 = arith.constant dense<0.000000e+00> : vector<1x128xf32>
    %112 = tpu.matmul %110, %6, %cst_36 {dimension_numbers = #tpu.dot_dimension_numbers<[1], [0], [0], [1], [0, 0, 1, 1], [], []>} : vector<1x128xf32>, vector<128x128xf32>, vector<1x128xf32> -> vector<1x128xf32>
    %113 = arith.addf %111, %112 : vector<1x128xf32>
    %114 = arith.negf %113 : vector<1x128xf32>
    %115 = math.exp %114 : vector<1x128xf32>
    %cst_37 = arith.constant 1.000000e+00 : f32
    %116 = vector.broadcast %cst_37 : f32 to vector<1x128xf32>
    %117 = arith.addf %116, %115 : vector<1x128xf32>
    %118 = arith.divf %116, %117 : vector<1x128xf32>
    %119 = math.tanh %113 : vector<1x128xf32>
    %c96_i32_38 = arith.constant 96 : i32
    %120 = tpu.dynamic_rotate %118 by %c96_i32_38 dim 1 : vector<1x128xf32>, i32 -> vector<1x128xf32>
    %c64_i32_39 = arith.constant 64 : i32
    %121 = tpu.dynamic_rotate %119 by %c64_i32_39 dim 1 : vector<1x128xf32>, i32 -> vector<1x128xf32>
    %c32_i32_40 = arith.constant 32 : i32
    %122 = tpu.dynamic_rotate %118 by %c32_i32_40 dim 1 : vector<1x128xf32>, i32 -> vector<1x128xf32>
    %123 = arith.mulf %120, %108 : vector<1x128xf32>
    %124 = arith.mulf %118, %121 : vector<1x128xf32>
    %125 = arith.addf %123, %124 : vector<1x128xf32>
    %126 = math.tanh %125 : vector<1x128xf32>
    %127 = arith.mulf %122, %126 : vector<1x128xf32>
    %128 = vector.extract_strided_slice %5 {offsets = [7, 0], sizes = [1, 128], strides = [1, 1]} : vector<8x128xf32> to vector<1x128xf32>
    %cst_41 = arith.constant dense<0.000000e+00> : vector<1x128xf32>
    %129 = tpu.matmul %127, %6, %cst_41 {dimension_numbers = #tpu.dot_dimension_numbers<[1], [0], [0], [1], [0, 0, 1, 1], [], []>} : vector<1x128xf32>, vector<128x128xf32>, vector<1x128xf32> -> vector<1x128xf32>
    %130 = arith.addf %128, %129 : vector<1x128xf32>
    %131 = arith.negf %130 : vector<1x128xf32>
    %132 = math.exp %131 : vector<1x128xf32>
    %cst_42 = arith.constant 1.000000e+00 : f32
    %133 = vector.broadcast %cst_42 : f32 to vector<1x128xf32>
    %134 = arith.addf %133, %132 : vector<1x128xf32>
    %135 = arith.divf %133, %134 : vector<1x128xf32>
    %136 = math.tanh %130 : vector<1x128xf32>
    %c96_i32_43 = arith.constant 96 : i32
    %137 = tpu.dynamic_rotate %135 by %c96_i32_43 dim 1 : vector<1x128xf32>, i32 -> vector<1x128xf32>
    %c64_i32_44 = arith.constant 64 : i32
    %138 = tpu.dynamic_rotate %136 by %c64_i32_44 dim 1 : vector<1x128xf32>, i32 -> vector<1x128xf32>
    %c32_i32_45 = arith.constant 32 : i32
    %139 = tpu.dynamic_rotate %135 by %c32_i32_45 dim 1 : vector<1x128xf32>, i32 -> vector<1x128xf32>
    %140 = arith.mulf %137, %125 : vector<1x128xf32>
    %141 = arith.mulf %135, %138 : vector<1x128xf32>
    %142 = arith.addf %140, %141 : vector<1x128xf32>
    %143 = math.tanh %142 : vector<1x128xf32>
    %144 = arith.mulf %139, %143 : vector<1x128xf32>
    %145 = tpu.concatenate %25, %42, %59, %76, %93, %110, %127, %144 in 0 : vector<1x128xf32>, vector<1x128xf32>, vector<1x128xf32>, vector<1x128xf32>, vector<1x128xf32>, vector<1x128xf32>, vector<1x128xf32>, vector<1x128xf32> -> vector<8x128xf32>
    %c0_46 = arith.constant 0 : index
    %c0_47 = arith.constant 0 : index
    %146 = vector.load %arg4[%c0_46, %c0_47] : memref<128x128xf32, #tpu.memory_space<vmem>>, vector<128x128xf32>
    %cst_48 = arith.constant dense<0.000000e+00> : vector<8x128xf32>
    %147 = tpu.matmul %145, %146, %cst_48 {dimension_numbers = #tpu.dot_dimension_numbers<[1], [0], [0], [1], [0, 0, 1, 1], [], []>} : vector<8x128xf32>, vector<128x128xf32>, vector<8x128xf32> -> vector<8x128xf32>
    %c0_49 = arith.constant 0 : index
    %c0_50 = arith.constant 0 : index
    %148 = vector.load %arg5[%c0_49, %c0_50] : memref<1x128xf32, #tpu.memory_space<vmem>>, vector<1x128xf32>
    %149 = vector.broadcast %148 : vector<1x128xf32> to vector<8x128xf32>
    %150 = arith.addf %147, %149 : vector<8x128xf32>
    %151 = arith.negf %150 : vector<8x128xf32>
    %152 = math.exp %151 : vector<8x128xf32>
    %cst_51 = arith.constant 1.000000e+00 : f32
    %153 = vector.broadcast %cst_51 : f32 to vector<8x128xf32>
    %154 = arith.addf %153, %152 : vector<8x128xf32>
    %155 = arith.divf %153, %154 : vector<8x128xf32>
    %c0_52 = arith.constant 0 : index
    %c0_53 = arith.constant 0 : index
    %156 = vector.load %arg6[%c0_52, %c0_53] : memref<8x128xf32, #tpu.memory_space<vmem>>, vector<8x128xf32>
    tpu.vector_store %arg6[%c0_52, %c0_53], %155 {strides = array<i32>} : memref<8x128xf32, #tpu.memory_space<vmem>>, vector<8x128xf32>,
    return
  }
}

</mosaic_0001>

<bundles_post_ra>
// kernel: tpu_custom_call.1
= control target key start
LH: loop header
LB: loop body
LE: loop exit
PB: predicated region body
PF: predicated region fallthrough
CT: control target
= control target key end

     0   :  { %11 = vsyncpa [#allocation3], 0  ;;  %s2298_s0 = inlined_call_operand.hbm [shape: f32[8,16], index: 0, kind: input, shape index: {}]   ;;  %s2299_s1 = inlined_call_operand.hbm [shape: f32[16,128], index: 1, kind: input, shape index: {}]   ;;  %s2300_s2 = inlined_call_operand.hbm [shape: f32[128,128], index: 2, kind: input, shape index: {}]   ;;  %s2301_s3 = inlined_call_operand.vmem [shape: f32[1,128], index: 3, kind: input, shape index: {}]   ;;  %s2302_s4 = inlined_call_operand.hbm [shape: f32[128,128], index: 4, kind: input, shape index: {}]   ;;  %s2303_s5 = inlined_call_operand.vmem [shape: f32[1,128], index: 5, kind: input, shape index: {}]   ;;  %s2304_s6 = inlined_call_operand.hbm [shape: f32[8,128], index: 6, kind: output, shape index: {}]  }
   0x1   :  { %12 = vsyncpa [#allocation6], 0 }
   0x2   :  { %13 = vsyncpa [#allocation9], 0 }
   0x3   :  { %14 = vsyncpa [#allocation4], 0  ;;  %s1824_s21 = smov [#allocation5]  }
   0x4   :  { %s30_s22 = sshll.u32 %s1824_s21, 4  ;;  %s31_s22 = int_to_ptr.vmem [resolvable:$true] %s30_s22 }
   0x5   :  { %s1724_s23 = scalar_lea.vmem %s31_s22, 256  ;;  %p1729_p1 = scmp.lt.s32.totalorder %s31_s22, %s31_s22 }
   0x6   :  { %p1725_p0 = scmp.ne.s32.totalorder %s31_s22, %s1724_s23  ;;  %p1730_p2 = scmp.lt.s32.totalorder %s1724_s23, %s1724_s23 }
   0x8   :  { %p1731_p3 = por %p1730_p2, %p1729_p1 }
   0xa   :  { %p1732_p4 = pnand %p1731_p3, %p1725_p0 }
   0xc   :  { %1735 = shalt.err (!%p1732_p4)
}
   0xd   :  { %s1825_s24 = smov 128   ;;  %s1826_s25 = smov 8  }
   0xe   :  { %36 = dma.hbm_to_vmem [thread:$0]  %s2299_s1, 256, %s31_s22, [#allocation6], %s1825_s24, %s1825_s24, %s1826_s25  }
   0xf   :  { %s1827_s28 = smov [#allocation2]   ;;  %s1828_s30 = smov [#allocation7]  }
  0x10   :  { %s21_s29 = sshll.u32 %s1827_s28, 4  ;;  %s42_s7 = sshll.u32 %s1828_s30, 4  ;;  %s22_s29 = int_to_ptr.vmem [resolvable:$true] %s21_s29  ;;  %s43_s7 = int_to_ptr.vmem [resolvable:$true] %s42_s7 }
  0x11   :  { %s1744_s8 = scalar_lea.vmem %s22_s29, 128  ;;  %p1749_p6 = scmp.lt.s32.totalorder %s22_s29, %s22_s29 }
  0x12   :  { %p1745_p5 = scmp.ne.s32.totalorder %s22_s29, %s1744_s8  ;;  %p1750_p7 = scmp.lt.s32.totalorder %s1744_s8, %s1744_s8 }
  0x14   :  { %p1751_p8 = por %p1750_p7, %p1749_p6 }
  0x16   :  { %p1752_p9 = pnand %p1751_p8, %p1745_p5 }
  0x18   :  { %1755 = shalt.err (!%p1752_p9)
}
  0x19   :  { %24 = dma.hbm_to_vmem [thread:$0]  %s2298_s0, 128, %s22_s29, [#allocation3]  }
  0x1a   :  { %s1764_s11 = scalar_lea.vmem %s43_s7, 2048  ;;  %p1769_p11 = scmp.lt.s32.totalorder %s43_s7, %s43_s7 }
  0x1b   :  { %p1765_p10 = scmp.ne.s32.totalorder %s43_s7, %s1764_s11  ;;  %p1770_p12 = scmp.lt.s32.totalorder %s1764_s11, %s1764_s11 }
  0x1d   :  { %p1771_p13 = por %p1770_p12, %p1769_p11 }
  0x1f   :  { %p1772_p0 = pnand %p1771_p13, %p1765_p10 }
  0x21   :  { %1775 = shalt.err (!%p1772_p0)
}
  0x22   :  { %48 = dma.hbm_to_vmem [thread:$0]  %s2300_s2, 2048, %s43_s7, [#allocation6], %s1825_s24, %s1825_s24, %s1826_s25  }
  0x23   :  { %s1829_s13 = smov [#allocation8]  }
  0x24   :  { %s56_s14 = sshll.u32 %s1829_s13, 4  ;;  %s57_s14 = int_to_ptr.vmem [resolvable:$true] %s56_s14 }
  0x25   :  { %s1784_s15 = scalar_lea.vmem %s57_s14, 2048  ;;  %p1789_p2 = scmp.lt.s32.totalorder %s57_s14, %s57_s14 }
  0x26   :  { %p1785_p1 = scmp.ne.s32.totalorder %s57_s14, %s1784_s15  ;;  %p1790_p3 = scmp.lt.s32.totalorder %s1784_s15, %s1784_s15 }
  0x28   :  { %p1791_p4 = por %p1790_p3, %p1789_p2 }
  0x2a   :  { %p1792_p5 = pnand %p1791_p4, %p1785_p1 }
  0x2c   :  { %1795 = shalt.err (!%p1792_p5)
}
  0x2d   :  { %62 = dma.hbm_to_vmem [thread:$0]  %s2302_s4, 2048, %s57_s14, [#allocation9], %s1825_s24, %s1825_s24, %s1826_s25  }
  0x2e   :  { %1816 = dma.done.wait [#allocation3], 128  }
  0x2f   :  { %1817 = vsyncadd [#allocation3], 4294967168 }
  0x30   :  { %1818 = dma.done.wait [#allocation6], 2304  }
  0x31   :  { %1819 = vsyncadd [#allocation6], 4294964992 }
  0x32   :  { %1820 = dma.done.wait [#allocation9], 2048  }
  0x33   :  { %1821 = vsyncadd [#allocation9], 4294965248  ;;  %v1830_v0 = vmov 0.0   ;;  %vm1831_vm0 = vmmov 0   ;;  %v1898_v1 = vld [vmem:[#allocation7 + $0x78] sm:$0xff]  ;;  %v1900_v2 = vld [vmem:[#allocation7 + $0x70] sm:$0xff] }
  0x34   :  { %1321 = vmatprep.subr.mxu1 %v1830_v0  ;;  %1314 = vmatprep.subr.mxu0 %v1830_v0  ;;  %v1904_v3 = vld [vmem:[#allocation7 + $0x68] sm:$0xff]  ;;  %v1908_v4 = vld [vmem:[#allocation7 + $0x60] sm:$0xff]  ;;  %v79_v5 = vld [vmem:[#allocation5 + $0x8] sm:$0xff]  ;;  %vm87_vm1 = vcmask 130048   ;;  %s1832_s17 = smov 32   ;;  %s1833_s18 = smov 96  }
  0x35   :  { %1318 = vmatprep.mubr.msk.f32.mxu0 %vm1831_vm0, %v1830_v0  ;;  %1353 = vmatprep.mubr.msk.f32.mxu1 %vm1831_vm0, %v1830_v0  ;;  %v78_v6 = vld [vmem:[#allocation5] sm:$0xff]  ;;  %v77_v7 = vld [vmem:[#allocation2] sm:$0xff]  ;;  %v1912_v8 = vld [vmem:[#allocation7 + $0x58] sm:$0xff]  ;;  %vm1015_vm2 = vcmask 1040384   ;;  %vm1017_vm3 = vcmask 1041408   ;;  %vm1019_vm4 = vcmask 1042432  }
  0x36   :  { %1322 = vmatpush3.msra.mxu1 %v1898_v1  ;;  %1315 = vmatpush3.msra.mxu0 %v79_v5  ;;  %v1917_v9 = vld [vmem:[#allocation7 + $0x50] sm:$0xff]  ;;  %v1922_v10 = vld [vmem:[#allocation7 + $0x48] sm:$0xff]  ;;  %v1928_v11 = vld [vmem:[#allocation7 + $0x40] sm:$0xff]  ;;  %vm1021_vm5 = vcmask 1043456   ;;  %vm1023_vm6 = vcmask 1044480   ;;  %vm1025_vm7 = vcmask 1045504  }
  0x37   :  { %1323 = vmatprep.subr.mxu1 %v1830_v0  ;;  %1316 = vmatprep.subr.mxu0 %v1830_v0  ;;  %v1934_v12 = vld [vmem:[#allocation7 + $0x38] sm:$0xff]  ;;  %v1940_v13 = vld [vmem:[#allocation7 + $0x30] sm:$0xff]  ;;  %v1946_v14 = vld [vmem:[#allocation7 + $0x28] sm:$0xff]  ;;  %vm1027_vm8 = vcmask 1046528   ;;  %s1835_s21 = smov [#allocation10]  }
  0x38   :  { %1324 = vmatpush3.msra.mxu1 %v1900_v2  ;;  %1317 = vmatpush3.msra.mxu0 %v78_v6  ;;  %v1952_v15 = vld [vmem:[#allocation7 + $0x20] sm:$0xff]  ;;  %v1958_v16 = vld [vmem:[#allocation7 + $0x18] sm:$0xff]  ;;  %v1964_v17 = vld [vmem:[#allocation7 + $0x10] sm:$0xff]  ;;  %s1135_s22 = sshll.u32 %s1835_s21, 4  ;;  %s1136_s22 = int_to_ptr.vmem [resolvable:$true] %s1135_s22 }
  0x39   :  { %1325 = vmatprep.subr.mxu1 %v1830_v0  ;;  %1319 = vmatmul.mubr.msk.f32.vlgmr.msra.gmra.mxu0 %vm87_vm1, %v77_v7  ;;  %v1970_v18 = vld [vmem:[#allocation7 + $0x8] sm:$0xff]  ;;  %v1976_v19 = vld [vmem:[#allocation7] sm:$0xff]  ;;  %s1796_s23 = scalar_lea.vmem %s1136_s22, 128  ;;  %p1801_p7 = scmp.lt.s32.totalorder %s1136_s22, %s1136_s22 }
  0x3a   :  { %1326 = vmatpush3.msra.mxu1 %v1904_v3  ;;  %1356 = vmatprep.subr.mxu0 %v1830_v0  ;;  %v1146_v22 = vld [vmem:[%s2301_s3] ss:$0 sm:$0xff]  ;;  %s1834_s3 = smov 64   ;;  %p1797_p6 = scmp.ne.s32.totalorder %s1136_s22, %s1796_s23 }
  0x3b   :  { %1327 = vmatprep.subr.mxu1 %v1830_v0  ;;  %1357 = vmatpush3.msra.mxu0 %v1898_v1  ;;  %p1802_p8 = scmp.lt.s32.totalorder %s1796_s23, %s1796_s23 }
  0x3c   :  { %1328 = vmatpush3.msra.mxu1 %v1908_v4  ;;  %1358 = vmatprep.subr.mxu0 %v1830_v0 }
  0x3d   :  { %1329 = vmatprep.subr.mxu1 %v1830_v0  ;;  %1359 = vmatpush3.msra.mxu0 %v1900_v2  ;;  %p1803_p9 = por %p1802_p8, %p1801_p7 }
  0x3e   :  { %1330 = vmatpush3.msra.mxu1 %v1912_v8  ;;  %1360 = vmatprep.subr.mxu0 %v1830_v0 }
  0x3f   :  { %1331 = vmatprep.subr.mxu1 %v1830_v0  ;;  %1361 = vmatpush3.msra.mxu0 %v1904_v3  ;;  %p1804_p10 = pnand %p1803_p9, %p1797_p6 }
  0x40   :  { %1332 = vmatpush3.msra.mxu1 %v1917_v9  ;;  %1362 = vmatprep.subr.mxu0 %v1830_v0 }
  0x41   :  { %1333 = vmatprep.subr.mxu1 %v1830_v0  ;;  %1363 = vmatpush3.msra.mxu0 %v1908_v4 }
  0x42   :  { %1334 = vmatpush3.msra.mxu1 %v1922_v10  ;;  %1364 = vmatprep.subr.mxu0 %v1830_v0 }
  0x43   :  { %1335 = vmatprep.subr.mxu1 %v1830_v0  ;;  %1365 = vmatpush3.msra.mxu0 %v1912_v8 }
  0x44   :  { %1336 = vmatpush3.msra.mxu1 %v1928_v11  ;;  %1366 = vmatprep.subr.mxu0 %v1830_v0 }
  0x45   :  { %1337 = vmatprep.subr.mxu1 %v1830_v0  ;;  %1367 = vmatpush3.msra.mxu0 %v1917_v9 }
  0x46   :  { %1338 = vmatpush3.msra.mxu1 %v1934_v12  ;;  %1368 = vmatprep.subr.mxu0 %v1830_v0 }
  0x47   :  { %1339 = vmatprep.subr.mxu1 %v1830_v0  ;;  %1369 = vmatpush3.msra.mxu0 %v1922_v10 }
  0x48   :  { %1340 = vmatpush3.msra.mxu1 %v1940_v13  ;;  %1370 = vmatprep.subr.mxu0 %v1830_v0 }
  0x49   :  { %1341 = vmatprep.subr.mxu1 %v1830_v0  ;;  %1371 = vmatpush3.msra.mxu0 %v1928_v11 }
  0x4a   :  { %1342 = vmatpush3.msra.mxu1 %v1946_v14  ;;  %1372 = vmatprep.subr.mxu0 %v1830_v0 }
  0x4b   :  { %1343 = vmatprep.subr.mxu1 %v1830_v0  ;;  %1373 = vmatpush3.msra.mxu0 %v1934_v12 }
  0x4c   :  { %1344 = vmatpush3.msra.mxu1 %v1952_v15  ;;  %1374 = vmatprep.subr.mxu0 %v1830_v0 }
  0x4d   :  { %1345 = vmatprep.subr.mxu1 %v1830_v0  ;;  %1375 = vmatpush3.msra.mxu0 %v1940_v13 }
  0x4e   :  { %1346 = vmatpush3.msra.mxu1 %v1958_v16  ;;  %1376 = vmatprep.subr.mxu0 %v1830_v0 }
  0x4f   :  { %1347 = vmatprep.subr.mxu1 %v1830_v0  ;;  %1377 = vmatpush3.msra.mxu0 %v1946_v14 }
  0x50   :  { %1348 = vmatpush3.msra.mxu1 %v1964_v17  ;;  %1378 = vmatprep.subr.mxu0 %v1830_v0 }
  0x51   :  { %1349 = vmatprep.subr.mxu1 %v1830_v0  ;;  %1379 = vmatpush3.msra.mxu0 %v1952_v15 }
  0x52   :  { %1350 = vmatpush3.msra.mxu1 %v1970_v18  ;;  %1380 = vmatprep.subr.mxu0 %v1830_v0 }
  0x53   :  { %1351 = vmatprep.subr.mxu1 %v1830_v0  ;;  %1388 = vmatprep.mubr.msk.f32.mxu0 %vm1831_vm0, %v1830_v0 }
  0x54   :  { %1352 = vmatpush3.msra.mxu1 %v1976_v19  ;;  %1381 = vmatpush3.msra.mxu0 %v1958_v16 }
  0x55   :  { %1354 = vmatmul.mubr.f32.vlgmr.msra.gmra.mxu1 %v1830_v0  ;;  %1391 = vmatprep.subr.mxu1 %v1830_v0 }
  0x56   :  { %1382 = vmatprep.subr.mxu0 %v1830_v0  ;;  %1392 = vmatpush3.msra.mxu1 %v1898_v1 }
  0x57   :  { %1383 = vmatpush3.msra.mxu0 %v1964_v17  ;;  %1393 = vmatprep.subr.mxu1 %v1830_v0 }
  0x58   :  { %1384 = vmatprep.subr.mxu0 %v1830_v0  ;;  %1394 = vmatpush3.msra.mxu1 %v1900_v2 }
  0x59   :  { %1385 = vmatpush3.msra.mxu0 %v1970_v18  ;;  %1395 = vmatprep.subr.mxu1 %v1830_v0 }
  0x5a   :  { %1386 = vmatprep.subr.mxu0 %v1830_v0  ;;  %1396 = vmatpush3.msra.mxu1 %v1904_v3 }
  0x5b   :  { %1387 = vmatpush3.msra.mxu0 %v1976_v19  ;;  %1397 = vmatprep.subr.mxu1 %v1830_v0 }
  0x5c   :  { %1398 = vmatpush3.msra.mxu1 %v1908_v4  ;;  %1423 = vmatprep.mubr.msk.f32.mxu1 %vm1831_vm0, %v1830_v0 }
  0x5d   :  { %1399 = vmatprep.subr.mxu1 %v1830_v0  ;;  %1426 = vmatprep.subr.mxu0 %v1830_v0 }
  0x5e   :  { %1400 = vmatpush3.msra.mxu1 %v1912_v8 }
  0x5f   :  { %1401 = vmatprep.subr.mxu1 %v1830_v0 }
  0x60   :  { %1402 = vmatpush3.msra.mxu1 %v1917_v9 }
  0x61   :  { %1403 = vmatprep.subr.mxu1 %v1830_v0 }
  0x62   :  { %1404 = vmatpush3.msra.mxu1 %v1922_v10 }
  0x63   :  { %1405 = vmatprep.subr.mxu1 %v1830_v0 }
  0x64   :  { %1406 = vmatpush3.msra.mxu1 %v1928_v11 }
  0x65   :  { %1407 = vmatprep.subr.mxu1 %v1830_v0 }
  0x66   :  { %1408 = vmatpush3.msra.mxu1 %v1934_v12 }
  0x67   :  { %1409 = vmatprep.subr.mxu1 %v1830_v0 }
  0x68   :  { %1410 = vmatpush3.msra.mxu1 %v1940_v13 }
  0x69   :  { %1411 = vmatprep.subr.mxu1 %v1830_v0 }
  0x6a   :  { %1412 = vmatpush3.msra.mxu1 %v1946_v14 }
  0x6b   :  { %1413 = vmatprep.subr.mxu1 %v1830_v0 }
  0x6c   :  { %1414 = vmatpush3.msra.mxu1 %v1952_v15 }
  0x6d   :  { %1415 = vmatprep.subr.mxu1 %v1830_v0 }
  0x6e   :  { %1416 = vmatpush3.msra.mxu1 %v1958_v16 }
  0x6f   :  { %1417 = vmatprep.subr.mxu1 %v1830_v0 }
  0x70   :  { %1418 = vmatpush3.msra.mxu1 %v1964_v17 }
  0x71   :  { %1419 = vmatprep.subr.mxu1 %v1830_v0 }
  0x72   :  { %1420 = vmatpush3.msra.mxu1 %v1970_v18 }
  0x73   :  { %1421 = vmatprep.subr.mxu1 %v1830_v0 }
  0x74   :  { %1422 = vmatpush3.msra.mxu1 %v1976_v19 }
  0x75   :  { %1461 = vmatprep.subr.mxu1 %v1830_v0 }
  0xf9   :  { %v157_v20 = vpop.f32.mrf.mxu0 }
  0xfa   :  { %v2036_v23 = vadd.f32 %v1146_v22, %v157_v20 }
  0xfb   :  { %v1320_v21 = vpop.f32.mrf.mxu0 }
 0x115   :  { %v243_v24 = vpop.f32.mrf.mxu1 }
 0x116   :  { %v247_v25 = vadd.f32 %v243_v24, %v2036_v23 }
 0x117   :  { %v1355_v26 = vpop.f32.mrf.mxu1 }
 0x118   :  { %v1148_v27 = vmul.f32 -1.442695, %v247_v25 }
 0x11a   :  { %1648 = vpow2.f32 %v1148_v27 }
 0x127   :  { %v1649_v28 = vpop.eup %1648 }
 0x128   :  { %v251_v29 = vadd.f32 1.0, %v1649_v28 }
 0x12a   :  { %1650 = vrcp.f32 %v251_v29 }
 0x12b   :  { %1652 = vtanh.f32 %v247_v25 }
 0x137   :  { %v1651_v30 = vpop.eup %1650 }
 0x138   :  { %259 = vrot.lane.b32.xlu1 %v1651_v30, %s1832_s17  ;;  %255 = vrot.lane.b32.xlu0 %v1651_v30, %s1833_s18  ;;  %v1653_v31 = vpop.eup %1652 }
 0x13c   :  { %257 = vrot.lane.b32.xlu0 %v1653_v31, %s1834_s3 }
 0x1aa   :  { %v256_v32 = vpop.permute.xlu0 %255  ;;  %v260_v38 = vpop.permute.xlu1 %259 }
 0x1ab   :  { %v261_v34 = vmul.f32 0.0, %v256_v32 }
 0x1ae   :  { %v258_v33 = vpop.permute.xlu0 %257 }
 0x1af   :  { %v262_v35 = vmul.f32 %v1651_v30, %v258_v33 }
 0x1b1   :  { %v263_v36 = vadd.f32 %v262_v35, %v261_v34 }
 0x1b3   :  { %1654 = vtanh.f32 %v263_v36 }
 0x1c0   :  { %v1655_v37 = vpop.eup %1654 }
 0x1c1   :  { %v2042_v39 = vmul.f32 %v1655_v37, %v260_v38 }
 0x1c3   :  { %1389 = vmatmul.mubr.f32.vlgmr.msra.gmra.mxu0 %v2042_v39 }
 0x1c4   :  { %1427 = vmatpush3.msra.mxu0 %v1898_v1  ;;  %1458 = vmatprep.mubr.msk.f32.mxu0 %vm1831_vm0, %v1830_v0 }
 0x1c5   :  { %1428 = vmatprep.subr.mxu0 %v1830_v0 }
 0x1c6   :  { %1429 = vmatpush3.msra.mxu0 %v1900_v2 }
 0x1c7   :  { %1430 = vmatprep.subr.mxu0 %v1830_v0 }
 0x1c8   :  { %1431 = vmatpush3.msra.mxu0 %v1904_v3 }
 0x1c9   :  { %1432 = vmatprep.subr.mxu0 %v1830_v0 }
 0x1ca   :  { %1433 = vmatpush3.msra.mxu0 %v1908_v4 }
 0x1cb   :  { %1434 = vmatprep.subr.mxu0 %v1830_v0 }
 0x1cc   :  { %1435 = vmatpush3.msra.mxu0 %v1912_v8 }
 0x1cd   :  { %1436 = vmatprep.subr.mxu0 %v1830_v0 }
 0x1ce   :  { %1437 = vmatpush3.msra.mxu0 %v1917_v9 }
 0x1cf   :  { %1438 = vmatprep.subr.mxu0 %v1830_v0 }
 0x1d0   :  { %1439 = vmatpush3.msra.mxu0 %v1922_v10 }
 0x1d1   :  { %1440 = vmatprep.subr.mxu0 %v1830_v0 }
 0x1d2   :  { %1441 = vmatpush3.msra.mxu0 %v1928_v11 }
 0x1d3   :  { %1442 = vmatprep.subr.mxu0 %v1830_v0 }
 0x1d4   :  { %1443 = vmatpush3.msra.mxu0 %v1934_v12 }
 0x1d5   :  { %1444 = vmatprep.subr.mxu0 %v1830_v0 }
 0x1d6   :  { %1445 = vmatpush3.msra.mxu0 %v1940_v13 }
 0x1d7   :  { %1446 = vmatprep.subr.mxu0 %v1830_v0 }
 0x1d8   :  { %1447 = vmatpush3.msra.mxu0 %v1946_v14 }
 0x1d9   :  { %1448 = vmatprep.subr.mxu0 %v1830_v0 }
 0x1da   :  { %1449 = vmatpush3.msra.mxu0 %v1952_v15 }
 0x1db   :  { %1450 = vmatprep.subr.mxu0 %v1830_v0 }
 0x1dc   :  { %1451 = vmatpush3.msra.mxu0 %v1958_v16 }
 0x1dd   :  { %1452 = vmatprep.subr.mxu0 %v1830_v0 }
 0x1de   :  { %1453 = vmatpush3.msra.mxu0 %v1964_v17 }
 0x1df   :  { %1454 = vmatprep.subr.mxu0 %v1830_v0 }
 0x1e0   :  { %1455 = vmatpush3.msra.mxu0 %v1970_v18 }
 0x1e1   :  { %1456 = vmatprep.subr.mxu0 %v1830_v0 }
 0x1e2   :  { %1457 = vmatpush3.msra.mxu0 %v1976_v19 }
 0x1e3   :  { %1496 = vmatprep.subr.mxu0 %v1830_v0 }
 0x283   :  { %v332_v40 = vpop.f32.mrf.mxu0 }
 0x284   :  { %v337_v41 = vrot.slane %v332_v40, 7 }
 0x285   :  { %v1390_v42 = vpop.f32.mrf.mxu0 }
 0x286   :  { %v339_v43 = vadd.f32 %v337_v41, %v2036_v23 }
 0x288   :  { %v1149_v44 = vmul.f32 -1.442695, %v339_v43  ;;  %1656 = vtanh.f32 %v339_v43 }
 0x28a   :  { %1658 = vpow2.f32 %v1149_v44 }
 0x295   :  { %v1657_v45 = vpop.eup %1656 }
 0x296   :  { %v353_v46 = vrot.slane %v1657_v45, 1 }
 0x297   :  { %v1659_v47 = vpop.eup %1658 }
 0x298   :  { %v343_v48 = vadd.f32 1.0, %v1659_v47  ;;  %355 = vrot.lane.b32.xlu1 %v353_v46, %s1834_s3 }
 0x29a   :  { %1660 = vrcp.f32 %v343_v48 }
 0x2a7   :  { %v1661_v49 = vpop.eup %1660 }
 0x2a8   :  { %v348_v50 = vrot.slane %v1661_v49, 1 }
 0x2aa   :  { %357 = vrot.lane.b32.xlu1 %v348_v50, %s1832_s17  ;;  %350 = vrot.lane.b32.xlu0 %v348_v50, %s1833_s18 }
 0x30a   :  { %v356_v51 = vpop.permute.xlu1 %355 }
 0x30b   :  { %v361_v52 = vrot.slane %v356_v51, 7 }
 0x30d   :  { %v363_v53 = vmul.f32 %v1661_v49, %v361_v52 }
 0x30f   :  { %v365_v55 = vrot.slane %v363_v53, 1 }
 0x31c   :  { %v351_v54 = vpop.permute.xlu0 %350  ;;  %v358_v59 = vpop.permute.xlu1 %357 }
 0x31d   :  { %v359_v56 = vmul.f32 %v351_v54, %v263_v36 }
 0x31f   :  { %v367_v57 = vadd.f32 %v365_v55, %v359_v56 }
 0x321   :  { %1662 = vtanh.f32 %v367_v57 }
 0x32e   :  { %v1663_v58 = vpop.eup %1662 }
 0x32f   :  { %v2083_v60 = vmul.f32 %v1663_v58, %v358_v59 }
 0x331   :  { %1424 = vmatmul.mubr.f32.vlgmr.msra.gmra.mxu1 %v2083_v60  ;;  %v995_v34 = vrot.slane %v2083_v60, 7 }
 0x332   :  { %1462 = vmatpush3.msra.mxu1 %v1898_v1  ;;  %1493 = vmatprep.mubr.msk.f32.mxu1 %vm1831_vm0, %v1830_v0 }
 0x333   :  { %1463 = vmatprep.subr.mxu1 %v1830_v0  ;;  %v1016_v38 = vsel %vm1015_vm2, %v2042_v39, %v995_v34 }
 0x334   :  { %1464 = vmatpush3.msra.mxu1 %v1900_v2 }
 0x335   :  { %1465 = vmatprep.subr.mxu1 %v1830_v0 }
 0x336   :  { %1466 = vmatpush3.msra.mxu1 %v1904_v3 }
 0x337   :  { %1467 = vmatprep.subr.mxu1 %v1830_v0 }
 0x338   :  { %1468 = vmatpush3.msra.mxu1 %v1908_v4 }
 0x339   :  { %1469 = vmatprep.subr.mxu1 %v1830_v0 }
 0x33a   :  { %1470 = vmatpush3.msra.mxu1 %v1912_v8 }
 0x33b   :  { %1471 = vmatprep.subr.mxu1 %v1830_v0 }
 0x33c   :  { %1472 = vmatpush3.msra.mxu1 %v1917_v9 }
 0x33d   :  { %1473 = vmatprep.subr.mxu1 %v1830_v0 }
 0x33e   :  { %1474 = vmatpush3.msra.mxu1 %v1922_v10 }
 0x33f   :  { %1475 = vmatprep.subr.mxu1 %v1830_v0 }
 0x340   :  { %1476 = vmatpush3.msra.mxu1 %v1928_v11 }
 0x341   :  { %1477 = vmatprep.subr.mxu1 %v1830_v0 }
 0x342   :  { %1478 = vmatpush3.msra.mxu1 %v1934_v12 }
 0x343   :  { %1479 = vmatprep.subr.mxu1 %v1830_v0 }
 0x344   :  { %1480 = vmatpush3.msra.mxu1 %v1940_v13 }
 0x345   :  { %1481 = vmatprep.subr.mxu1 %v1830_v0 }
 0x346   :  { %1482 = vmatpush3.msra.mxu1 %v1946_v14 }
 0x347   :  { %1483 = vmatprep.subr.mxu1 %v1830_v0 }
 0x348   :  { %1484 = vmatpush3.msra.mxu1 %v1952_v15 }
 0x349   :  { %1485 = vmatprep.subr.mxu1 %v1830_v0 }
 0x34a   :  { %1486 = vmatpush3.msra.mxu1 %v1958_v16 }
 0x34b   :  { %1487 = vmatprep.subr.mxu1 %v1830_v0 }
 0x34c   :  { %1488 = vmatpush3.msra.mxu1 %v1964_v17 }
 0x34d   :  { %1489 = vmatprep.subr.mxu1 %v1830_v0 }
 0x34e   :  { %1490 = vmatpush3.msra.mxu1 %v1970_v18 }
 0x34f   :  { %1491 = vmatprep.subr.mxu1 %v1830_v0 }
 0x350   :  { %1492 = vmatpush3.msra.mxu1 %v1976_v19 }
 0x351   :  { %1531 = vmatprep.subr.mxu1 %v1830_v0 }
 0x3f1   :  { %v436_v61 = vpop.f32.mrf.mxu1 }
 0x3f2   :  { %v441_v62 = vrot.slane %v436_v61, 6 }
 0x3f3   :  { %v1425_v63 = vpop.f32.mrf.mxu1 }
 0x3f4   :  { %v443_v5 = vadd.f32 %v441_v62, %v2036_v23 }
 0x3f6   :  { %v1150_v6 = vmul.f32 -1.442695, %v443_v5  ;;  %1664 = vtanh.f32 %v443_v5 }
 0x3f8   :  { %1666 = vpow2.f32 %v1150_v6 }
 0x403   :  { %v1665_v7 = vpop.eup %1664 }
 0x404   :  { %v457_v20 = vrot.slane %v1665_v7, 2 }
 0x405   :  { %v1667_v21 = vpop.eup %1666 }
 0x406   :  { %v447_v22 = vadd.f32 1.0, %v1667_v21  ;;  %459 = vrot.lane.b32.xlu0 %v457_v20, %s1834_s3 }
 0x408   :  { %1668 = vrcp.f32 %v447_v22 }
 0x415   :  { %v1669_v24 = vpop.eup %1668 }
 0x416   :  { %v452_v25 = vrot.slane %v1669_v24, 2 }
 0x418   :  { %461 = vrot.lane.b32.xlu0 %v452_v25, %s1832_s17  ;;  %454 = vrot.lane.b32.xlu1 %v452_v25, %s1833_s18 }
 0x478   :  { %v460_v26 = vpop.permute.xlu0 %459 }
 0x479   :  { %v465_v27 = vrot.slane %v460_v26, 6 }
 0x47b   :  { %v467_v28 = vmul.f32 %v1669_v24, %v465_v27 }
 0x47d   :  { %v469_v30 = vrot.slane %v467_v28, 2 }
 0x48a   :  { %v455_v29 = vpop.permute.xlu1 %454  ;;  %v462_v35 = vpop.permute.xlu0 %461 }
 0x48b   :  { %v463_v31 = vmul.f32 %v455_v29, %v367_v57 }
 0x48d   :  { %v2124_v32 = vadd.f32 %v469_v30, %v463_v31 }
 0x48f   :  { %1670 = vtanh.f32 %v2124_v32 }
 0x49c   :  { %v1671_v33 = vpop.eup %1670 }
 0x49d   :  { %v473_v36 = vmul.f32 %v1671_v33, %v462_v35 }
 0x49f   :  { %1459 = vmatmul.mubr.f32.vlgmr.msra.gmra.mxu0 %v473_v36  ;;  %v998_v37 = vrot.slane %v473_v36, 6 }
 0x4a0   :  { %1497 = vmatpush3.msra.mxu0 %v1898_v1  ;;  %1528 = vmatprep.mubr.msk.f32.mxu0 %vm1831_vm0, %v1830_v0 }
 0x4a1   :  { %v2132_v40 = vsel %vm1017_vm3, %v1016_v38, %v998_v37  ;;  %1498 = vmatprep.subr.mxu0 %v1830_v0 }
 0x4a2   :  { %1499 = vmatpush3.msra.mxu0 %v1900_v2 }
 0x4a3   :  { %1500 = vmatprep.subr.mxu0 %v1830_v0 }
 0x4a4   :  { %1501 = vmatpush3.msra.mxu0 %v1904_v3 }
 0x4a5   :  { %1502 = vmatprep.subr.mxu0 %v1830_v0 }
 0x4a6   :  { %1503 = vmatpush3.msra.mxu0 %v1908_v4 }
 0x4a7   :  { %1504 = vmatprep.subr.mxu0 %v1830_v0 }
 0x4a8   :  { %1505 = vmatpush3.msra.mxu0 %v1912_v8 }
 0x4a9   :  { %1506 = vmatprep.subr.mxu0 %v1830_v0 }
 0x4aa   :  { %1507 = vmatpush3.msra.mxu0 %v1917_v9 }
 0x4ab   :  { %1508 = vmatprep.subr.mxu0 %v1830_v0 }
 0x4ac   :  { %1509 = vmatpush3.msra.mxu0 %v1922_v10 }
 0x4ad   :  { %1510 = vmatprep.subr.mxu0 %v1830_v0 }
 0x4ae   :  { %1511 = vmatpush3.msra.mxu0 %v1928_v11 }
 0x4af   :  { %1512 = vmatprep.subr.mxu0 %v1830_v0 }
 0x4b0   :  { %1513 = vmatpush3.msra.mxu0 %v1934_v12 }
 0x4b1   :  { %1514 = vmatprep.subr.mxu0 %v1830_v0 }
 0x4b2   :  { %1515 = vmatpush3.msra.mxu0 %v1940_v13 }
 0x4b3   :  { %1516 = vmatprep.subr.mxu0 %v1830_v0 }
 0x4b4   :  { %1517 = vmatpush3.msra.mxu0 %v1946_v14 }
 0x4b5   :  { %1518 = vmatprep.subr.mxu0 %v1830_v0 }
 0x4b6   :  { %1519 = vmatpush3.msra.mxu0 %v1952_v15 }
 0x4b7   :  { %1520 = vmatprep.subr.mxu0 %v1830_v0 }
 0x4b8   :  { %1521 = vmatpush3.msra.mxu0 %v1958_v16 }
 0x4b9   :  { %1522 = vmatprep.subr.mxu0 %v1830_v0 }
 0x4ba   :  { %1523 = vmatpush3.msra.mxu0 %v1964_v17 }
 0x4bb   :  { %1524 = vmatprep.subr.mxu0 %v1830_v0 }
 0x4bc   :  { %1525 = vmatpush3.msra.mxu0 %v1970_v18 }
 0x4bd   :  { %1526 = vmatprep.subr.mxu0 %v1830_v0 }
 0x4be   :  { %1527 = vmatpush3.msra.mxu0 %v1976_v19 }
 0x4bf   :  { %1566 = vmatprep.subr.mxu0 %v1830_v0 }
 0x55f   :  { %v540_v39 = vpop.f32.mrf.mxu0 }
 0x560   :  { %v545_v41 = vrot.slane %v540_v39, 5 }
 0x561   :  { %v1460_v42 = vpop.f32.mrf.mxu0 }
 0x562   :  { %v547_v43 = vadd.f32 %v545_v41, %v2036_v23 }
 0x564   :  { %v1151_v44 = vmul.f32 -1.442695, %v547_v43  ;;  %1672 = vtanh.f32 %v547_v43 }
 0x566   :  { %1674 = vpow2.f32 %v1151_v44 }
 0x571   :  { %v1673_v45 = vpop.eup %1672 }
 0x572   :  { %v561_v46 = vrot.slane %v1673_v45, 3 }
 0x573   :  { %v1675_v47 = vpop.eup %1674 }
 0x574   :  { %v551_v48 = vadd.f32 1.0, %v1675_v47  ;;  %563 = vrot.lane.b32.xlu1 %v561_v46, %s1834_s3 }
 0x576   :  { %1676 = vrcp.f32 %v551_v48 }
 0x583   :  { %v1677_v49 = vpop.eup %1676 }
 0x584   :  { %v556_v50 = vrot.slane %v1677_v49, 3 }
 0x586   :  { %565 = vrot.lane.b32.xlu1 %v556_v50, %s1832_s17  ;;  %558 = vrot.lane.b32.xlu0 %v556_v50, %s1833_s18 }
 0x5e6   :  { %v564_v51 = vpop.permute.xlu1 %563 }
 0x5e7   :  { %v569_v52 = vrot.slane %v564_v51, 5 }
 0x5e9   :  { %v571_v53 = vmul.f32 %v1677_v49, %v569_v52 }
 0x5eb   :  { %v573_v55 = vrot.slane %v571_v53, 3 }
 0x5f8   :  { %v559_v54 = vpop.permute.xlu0 %558  ;;  %v566_v59 = vpop.permute.xlu1 %565 }
 0x5f9   :  { %v567_v56 = vmul.f32 %v559_v54, %v2124_v32 }
 0x5fb   :  { %v2170_v57 = vadd.f32 %v573_v55, %v567_v56 }
 0x5fd   :  { %1678 = vtanh.f32 %v2170_v57 }
 0x60a   :  { %v1679_v58 = vpop.eup %1678 }
 0x60b   :  { %v577_v60 = vmul.f32 %v1679_v58, %v566_v59 }
 0x60d   :  { %1494 = vmatmul.mubr.f32.vlgmr.msra.gmra.mxu1 %v577_v60  ;;  %v1001_v61 = vrot.slane %v577_v60, 5 }
 0x60e   :  { %1532 = vmatpush3.msra.mxu1 %v1898_v1  ;;  %1563 = vmatprep.mubr.msk.f32.mxu1 %vm1831_vm0, %v1830_v0 }
 0x60f   :  { %1533 = vmatprep.subr.mxu1 %v1830_v0  ;;  %v2178_v62 = vsel %vm1019_vm4, %v2132_v40, %v1001_v61 }
 0x610   :  { %1534 = vmatpush3.msra.mxu1 %v1900_v2 }
 0x611   :  { %1535 = vmatprep.subr.mxu1 %v1830_v0 }
 0x612   :  { %1536 = vmatpush3.msra.mxu1 %v1904_v3 }
 0x613   :  { %1537 = vmatprep.subr.mxu1 %v1830_v0 }
 0x614   :  { %1538 = vmatpush3.msra.mxu1 %v1908_v4 }
 0x615   :  { %1539 = vmatprep.subr.mxu1 %v1830_v0 }
 0x616   :  { %1540 = vmatpush3.msra.mxu1 %v1912_v8 }
 0x617   :  { %1541 = vmatprep.subr.mxu1 %v1830_v0 }
 0x618   :  { %1542 = vmatpush3.msra.mxu1 %v1917_v9 }
 0x619   :  { %1543 = vmatprep.subr.mxu1 %v1830_v0 }
 0x61a   :  { %1544 = vmatpush3.msra.mxu1 %v1922_v10 }
 0x61b   :  { %1545 = vmatprep.subr.mxu1 %v1830_v0 }
 0x61c   :  { %1546 = vmatpush3.msra.mxu1 %v1928_v11 }
 0x61d   :  { %1547 = vmatprep.subr.mxu1 %v1830_v0 }
 0x61e   :  { %1548 = vmatpush3.msra.mxu1 %v1934_v12 }
 0x61f   :  { %1549 = vmatprep.subr.mxu1 %v1830_v0 }
 0x620   :  { %1550 = vmatpush3.msra.mxu1 %v1940_v13 }
 0x621   :  { %1551 = vmatprep.subr.mxu1 %v1830_v0 }
 0x622   :  { %1552 = vmatpush3.msra.mxu1 %v1946_v14 }
 0x623   :  { %1553 = vmatprep.subr.mxu1 %v1830_v0 }
 0x624   :  { %1554 = vmatpush3.msra.mxu1 %v1952_v15 }
 0x625   :  { %1555 = vmatprep.subr.mxu1 %v1830_v0 }
 0x626   :  { %1556 = vmatpush3.msra.mxu1 %v1958_v16 }
 0x627   :  { %1557 = vmatprep.subr.mxu1 %v1830_v0 }
 0x628   :  { %1558 = vmatpush3.msra.mxu1 %v1964_v17 }
 0x629   :  { %1559 = vmatprep.subr.mxu1 %v1830_v0 }
 0x62a   :  { %1560 = vmatpush3.msra.mxu1 %v1970_v18 }
 0x62b   :  { %1561 = vmatprep.subr.mxu1 %v1830_v0 }
 0x62c   :  { %1562 = vmatpush3.msra.mxu1 %v1976_v19 }
 0x62d   :  { %1601 = vmatprep.subr.mxu1 %v1830_v0 }
 0x6cd   :  { %v644_v63 = vpop.f32.mrf.mxu1 }
 0x6ce   :  { %v649_v5 = vrot.slane %v644_v63, 4 }
 0x6cf   :  { %v1495_v6 = vpop.f32.mrf.mxu1 }
 0x6d0   :  { %v651_v7 = vadd.f32 %v649_v5, %v2036_v23 }
 0x6d2   :  { %v1152_v20 = vmul.f32 -1.442695, %v651_v7  ;;  %1680 = vtanh.f32 %v651_v7 }
 0x6d4   :  { %1682 = vpow2.f32 %v1152_v20 }
 0x6df   :  { %v1681_v21 = vpop.eup %1680 }
 0x6e0   :  { %v665_v22 = vrot.slane %v1681_v21, 4 }
 0x6e1   :  { %v1683_v24 = vpop.eup %1682 }
 0x6e2   :  { %v655_v25 = vadd.f32 1.0, %v1683_v24  ;;  %667 = vrot.lane.b32.xlu0 %v665_v22, %s1834_s3 }
 0x6e4   :  { %1684 = vrcp.f32 %v655_v25 }
 0x6f1   :  { %v1685_v26 = vpop.eup %1684 }
 0x6f2   :  { %v660_v27 = vrot.slane %v1685_v26, 4 }
 0x6f4   :  { %669 = vrot.lane.b32.xlu0 %v660_v27, %s1832_s17  ;;  %662 = vrot.lane.b32.xlu1 %v660_v27, %s1833_s18 }
 0x754   :  { %v668_v28 = vpop.permute.xlu0 %667 }
 0x755   :  { %v673_v29 = vrot.slane %v668_v28, 4 }
 0x757   :  { %v675_v30 = vmul.f32 %v1685_v26, %v673_v29  ;;  %v1044_v29 = vld [vmem:[#allocation8 + $0x78] sm:$0xff] }
 0x759   :  { %v677_v32 = vrot.slane %v675_v30, 4  ;;  %v1043_v30 = vld [vmem:[#allocation8 + $0x70] sm:$0xff] }
 0x766   :  { %v663_v31 = vpop.permute.xlu1 %662  ;;  %v670_v36 = vpop.permute.xlu0 %669 }
 0x767   :  { %v671_v33 = vmul.f32 %v663_v31, %v2170_v57  ;;  %v1042_v31 = vld [vmem:[#allocation8 + $0x68] sm:$0xff] }
 0x769   :  { %v2215_v34 = vadd.f32 %v677_v32, %v671_v33  ;;  %v1041_v32 = vld [vmem:[#allocation8 + $0x60] sm:$0xff] }
 0x76b   :  { %1686 = vtanh.f32 %v2215_v34 }
 0x778   :  { %v1687_v35 = vpop.eup %1686 }
 0x779   :  { %v681_v37 = vmul.f32 %v1687_v35, %v670_v36  ;;  %v1040_v36 = vld [vmem:[#allocation8 + $0x58] sm:$0xff] }
 0x77b   :  { %1529 = vmatmul.mubr.f32.vlgmr.msra.gmra.mxu0 %v681_v37  ;;  %v1004_v38 = vrot.slane %v681_v37, 4  ;;  %v1039_v37 = vld [vmem:[#allocation8 + $0x50] sm:$0xff] }
 0x77c   :  { %1567 = vmatpush3.msra.mxu0 %v1898_v1  ;;  %1598 = vmatprep.mubr.msk.f32.mxu0 %vm1831_vm0, %v1830_v0 }
 0x77d   :  { %1568 = vmatprep.subr.mxu0 %v1830_v0  ;;  %v2223_v40 = vsel %vm1021_vm5, %v2178_v62, %v1004_v38  ;;  %v1038_v38 = vld [vmem:[#allocation8 + $0x48] sm:$0xff] }
 0x77e   :  { %1569 = vmatpush3.msra.mxu0 %v1900_v2 }
 0x77f   :  { %1570 = vmatprep.subr.mxu0 %v1830_v0 }
 0x780   :  { %1571 = vmatpush3.msra.mxu0 %v1904_v3 }
 0x781   :  { %1572 = vmatprep.subr.mxu0 %v1830_v0 }
 0x782   :  { %1573 = vmatpush3.msra.mxu0 %v1908_v4 }
 0x783   :  { %1574 = vmatprep.subr.mxu0 %v1830_v0 }
 0x784   :  { %1575 = vmatpush3.msra.mxu0 %v1912_v8 }
 0x785   :  { %1576 = vmatprep.subr.mxu0 %v1830_v0 }
 0x786   :  { %1577 = vmatpush3.msra.mxu0 %v1917_v9 }
 0x787   :  { %1578 = vmatprep.subr.mxu0 %v1830_v0 }
 0x788   :  { %1579 = vmatpush3.msra.mxu0 %v1922_v10 }
 0x789   :  { %1580 = vmatprep.subr.mxu0 %v1830_v0 }
 0x78a   :  { %1581 = vmatpush3.msra.mxu0 %v1928_v11 }
 0x78b   :  { %1582 = vmatprep.subr.mxu0 %v1830_v0 }
 0x78c   :  { %1583 = vmatpush3.msra.mxu0 %v1934_v12 }
 0x78d   :  { %1584 = vmatprep.subr.mxu0 %v1830_v0 }
 0x78e   :  { %1585 = vmatpush3.msra.mxu0 %v1940_v13 }
 0x78f   :  { %1586 = vmatprep.subr.mxu0 %v1830_v0 }
 0x790   :  { %1587 = vmatpush3.msra.mxu0 %v1946_v14 }
 0x791   :  { %1588 = vmatprep.subr.mxu0 %v1830_v0 }
 0x792   :  { %1589 = vmatpush3.msra.mxu0 %v1952_v15 }
 0x793   :  { %1590 = vmatprep.subr.mxu0 %v1830_v0 }
 0x794   :  { %1591 = vmatpush3.msra.mxu0 %v1958_v16 }
 0x795   :  { %1592 = vmatprep.subr.mxu0 %v1830_v0 }
 0x796   :  { %1593 = vmatpush3.msra.mxu0 %v1964_v17 }
 0x797   :  { %1594 = vmatprep.subr.mxu0 %v1830_v0 }
 0x798   :  { %1595 = vmatpush3.msra.mxu0 %v1970_v18 }
 0x799   :  { %1596 = vmatprep.subr.mxu0 %v1830_v0 }
 0x79a   :  { %1597 = vmatpush3.msra.mxu0 %v1976_v19 }
 0x83b   :  { %v748_v1 = vpop.f32.mrf.mxu0 }
 0x83c   :  { %v753_v2 = vrot.slane %v748_v1, 3  ;;  %v1036_v1 = vld [vmem:[#allocation8 + $0x38] sm:$0xff] }
 0x83d   :  { %v1530_v3 = vpop.f32.mrf.mxu0 }
 0x83e   :  { %v755_v4 = vadd.f32 %v753_v2, %v2036_v23  ;;  %v1035_v2 = vld [vmem:[#allocation8 + $0x30] sm:$0xff]  ;;  %v1034_v3 = vld [vmem:[#allocation8 + $0x28] sm:$0xff] }
 0x840   :  { %v1153_v8 = vmul.f32 -1.442695, %v755_v4  ;;  %1688 = vtanh.f32 %v755_v4 }
 0x842   :  { %1690 = vpow2.f32 %v1153_v8 }
 0x84d   :  { %v1689_v9 = vpop.eup %1688 }
 0x84e   :  { %v769_v10 = vrot.slane %v1689_v9, 5  ;;  %v1033_v9 = vld [vmem:[#allocation8 + $0x20] sm:$0xff] }
 0x84f   :  { %v1691_v11 = vpop.eup %1690 }
 0x850   :  { %v759_v12 = vadd.f32 1.0, %v1691_v11  ;;  %771 = vrot.lane.b32.xlu1 %v769_v10, %s1834_s3  ;;  %v1032_v10 = vld [vmem:[#allocation8 + $0x18] sm:$0xff]  ;;  %v1031_v11 = vld [vmem:[#allocation8 + $0x10] sm:$0xff] }
 0x852   :  { %1692 = vrcp.f32 %v759_v12  ;;  %v1030_v12 = vld [vmem:[#allocation8 + $0x8] sm:$0xff] }
 0x85f   :  { %v1693_v13 = vpop.eup %1692 }
 0x860   :  { %v764_v14 = vrot.slane %v1693_v13, 5 }
 0x862   :  { %773 = vrot.lane.b32.xlu1 %v764_v14, %s1832_s17  ;;  %766 = vrot.lane.b32.xlu0 %v764_v14, %s1833_s18 }
 0x8c2   :  { %v772_v15 = vpop.permute.xlu1 %771 }
 0x8c3   :  { %v777_v16 = vrot.slane %v772_v15, 3 }
 0x8c5   :  { %v779_v17 = vmul.f32 %v1693_v13, %v777_v16  ;;  %v1029_v13 = vld [vmem:[#allocation8] sm:$0xff] }
 0x8c7   :  { %v781_v19 = vrot.slane %v779_v17, 5 }
 0x8d4   :  { %v767_v18 = vpop.permute.xlu0 %766  ;;  %v774_v43 = vpop.permute.xlu1 %773 }
 0x8d5   :  { %v775_v39 = vmul.f32 %v767_v18, %v2215_v34 }
 0x8d7   :  { %v783_v41 = vadd.f32 %v781_v19, %v775_v39 }
 0x8d9   :  { %1694 = vtanh.f32 %v783_v41 }
 0x8e6   :  { %v1695_v42 = vpop.eup %1694 }
 0x8e7   :  { %v785_v44 = vmul.f32 %v1695_v42, %v774_v43 }
 0x8e9   :  { %1564 = vmatmul.mubr.f32.vlgmr.msra.gmra.mxu1 %v785_v44  ;;  %v1007_v45 = vrot.slane %v785_v44, 3 }
 0x8ea   :  { %1633 = vmatprep.mubr.msk.f32.mxu1 %vm1831_vm0, %v1830_v0  ;;  %1602 = vmatpush3.msra.mxu1 %v1044_v29 }
 0x8eb   :  { %v1024_v46 = vsel %vm1023_vm6, %v2223_v40, %v1007_v45  ;;  %1603 = vmatprep.subr.mxu1 %v1830_v0  ;;  %v1037_v40 = vld [vmem:[#allocation8 + $0x40] sm:$0xff] }
 0x8ec   :  { %1604 = vmatpush3.msra.mxu1 %v1043_v30 }
 0x8ed   :  { %1605 = vmatprep.subr.mxu1 %v1830_v0 }
 0x8ee   :  { %1606 = vmatpush3.msra.mxu1 %v1042_v31 }
 0x8ef   :  { %1607 = vmatprep.subr.mxu1 %v1830_v0 }
 0x8f0   :  { %1608 = vmatpush3.msra.mxu1 %v1041_v32 }
 0x8f1   :  { %1609 = vmatprep.subr.mxu1 %v1830_v0 }
 0x8f2   :  { %1610 = vmatpush3.msra.mxu1 %v1040_v36 }
 0x8f3   :  { %1611 = vmatprep.subr.mxu1 %v1830_v0 }
 0x8f4   :  { %1612 = vmatpush3.msra.mxu1 %v1039_v37 }
 0x8f5   :  { %1613 = vmatprep.subr.mxu1 %v1830_v0 }
 0x8f6   :  { %1614 = vmatpush3.msra.mxu1 %v1038_v38 }
 0x8f7   :  { %1615 = vmatprep.subr.mxu1 %v1830_v0 }
 0x8f8   :  { %1616 = vmatpush3.msra.mxu1 %v1037_v40 }
 0x8f9   :  { %1617 = vmatprep.subr.mxu1 %v1830_v0 }
 0x8fa   :  { %1618 = vmatpush3.msra.mxu1 %v1036_v1 }
 0x8fb   :  { %1619 = vmatprep.subr.mxu1 %v1830_v0 }
 0x8fc   :  { %1620 = vmatpush3.msra.mxu1 %v1035_v2 }
 0x8fd   :  { %1621 = vmatprep.subr.mxu1 %v1830_v0 }
 0x8fe   :  { %1622 = vmatpush3.msra.mxu1 %v1034_v3 }
 0x8ff   :  { %1623 = vmatprep.subr.mxu1 %v1830_v0 }
 0x900   :  { %1624 = vmatpush3.msra.mxu1 %v1033_v9 }
 0x901   :  { %1625 = vmatprep.subr.mxu1 %v1830_v0 }
 0x902   :  { %1626 = vmatpush3.msra.mxu1 %v1032_v10 }
 0x903   :  { %1627 = vmatprep.subr.mxu1 %v1830_v0 }
 0x904   :  { %1628 = vmatpush3.msra.mxu1 %v1031_v11 }
 0x905   :  { %1629 = vmatprep.subr.mxu1 %v1830_v0 }
 0x906   :  { %1630 = vmatpush3.msra.mxu1 %v1030_v12 }
 0x907   :  { %1631 = vmatprep.subr.mxu1 %v1830_v0  ;;  %v1156_v0 = vld [vmem:[%s2303_s5] ss:$0 sm:$0xff] }
 0x908   :  { %1632 = vmatpush3.msra.mxu1 %v1029_v13 }
 0x9a9   :  { %v852_v47 = vpop.f32.mrf.mxu1 }
 0x9aa   :  { %v857_v48 = vrot.slane %v852_v47, 2 }
 0x9ab   :  { %v1565_v49 = vpop.f32.mrf.mxu1 }
 0x9ac   :  { %v859_v50 = vadd.f32 %v857_v48, %v2036_v23 }
 0x9ae   :  { %v1154_v51 = vmul.f32 -1.442695, %v859_v50  ;;  %1696 = vtanh.f32 %v859_v50 }
 0x9b0   :  { %1698 = vpow2.f32 %v1154_v51 }
 0x9bb   :  { %v1697_v52 = vpop.eup %1696 }
 0x9bc   :  { %v873_v53 = vrot.slane %v1697_v52, 6 }
 0x9bd   :  { %v1699_v54 = vpop.eup %1698 }
 0x9be   :  { %v863_v55 = vadd.f32 1.0, %v1699_v54  ;;  %875 = vrot.lane.b32.xlu0 %v873_v53, %s1834_s3 }
 0x9c0   :  { %1700 = vrcp.f32 %v863_v55 }
 0x9cd   :  { %v1701_v56 = vpop.eup %1700 }
 0x9ce   :  { %v868_v57 = vrot.slane %v1701_v56, 6 }
 0x9d0   :  { %877 = vrot.lane.b32.xlu0 %v868_v57, %s1832_s17  ;;  %870 = vrot.lane.b32.xlu1 %v868_v57, %s1833_s18 }
 0xa30   :  { %v876_v58 = vpop.permute.xlu0 %875 }
 0xa31   :  { %v881_v59 = vrot.slane %v876_v58, 2 }
 0xa33   :  { %v883_v60 = vmul.f32 %v1701_v56, %v881_v59 }
 0xa35   :  { %v885_v62 = vrot.slane %v883_v60, 6 }
 0xa42   :  { %v871_v61 = vpop.permute.xlu1 %870  ;;  %v878_v7 = vpop.permute.xlu0 %877 }
 0xa43   :  { %v879_v63 = vmul.f32 %v871_v61, %v783_v41 }
 0xa45   :  { %v2266_v5 = vadd.f32 %v885_v62, %v879_v63 }
 0xa47   :  { %1702 = vtanh.f32 %v2266_v5 }
 0xa54   :  { %v1703_v6 = vpop.eup %1702 }
 0xa55   :  { %v889_v20 = vmul.f32 %v1703_v6, %v878_v7 }
 0xa57   :  { %1599 = vmatmul.mubr.f32.vlgmr.msra.gmra.mxu0 %v889_v20  ;;  %v1010_v21 = vrot.slane %v889_v20, 2 }
 0xa59   :  { %v2269_v22 = vsel %vm1025_vm7, %v1024_v46, %v1010_v21 }
 0xb17   :  { %v956_v24 = vpop.f32.mrf.mxu0 }
 0xb18   :  { %v961_v25 = vrot.slane %v956_v24, 1 }
 0xb19   :  { %v1600_v26 = vpop.f32.mrf.mxu0 }
 0xb1a   :  { %v963_v27 = vadd.f32 %v961_v25, %v2036_v23 }
 0xb1c   :  { %v1155_v28 = vmul.f32 -1.442695, %v963_v27  ;;  %1704 = vtanh.f32 %v963_v27 }
 0xb1e   :  { %1706 = vpow2.f32 %v1155_v28 }
 0xb29   :  { %v1705_v33 = vpop.eup %1704 }
 0xb2a   :  { %v977_v34 = vrot.slane %v1705_v33, 7 }
 0xb2b   :  { %v1707_v23 = vpop.eup %1706 }
 0xb2c   :  { %v967_v35 = vadd.f32 1.0, %v1707_v23  ;;  %979 = vrot.lane.b32.xlu1 %v977_v34, %s1834_s3 }
 0xb2e   :  { %1708 = vrcp.f32 %v967_v35 }
 0xb3b   :  { %v1709_v4 = vpop.eup %1708 }
 0xb3c   :  { %v972_v8 = vrot.slane %v1709_v4, 7 }
 0xb3e   :  { %981 = vrot.lane.b32.xlu1 %v972_v8, %s1832_s17  ;;  %974 = vrot.lane.b32.xlu0 %v972_v8, %s1833_s18 }
 0xb9e   :  { %v980_v14 = vpop.permute.xlu1 %979 }
 0xb9f   :  { %v985_v15 = vrot.slane %v980_v14, 1 }
 0xba1   :  { %v987_v16 = vmul.f32 %v1709_v4, %v985_v15 }
 0xba3   :  { %v989_v18 = vrot.slane %v987_v16, 7 }
 0xbb0   :  { %v975_v17 = vpop.permute.xlu0 %974  ;;  %v982_v42 = vpop.permute.xlu1 %981 }
 0xbb1   :  { %v983_v19 = vmul.f32 %v975_v17, %v2266_v5 }
 0xbb3   :  { %v991_v39 = vadd.f32 %v989_v18, %v983_v19 }
 0xbb5   :  { %1710 = vtanh.f32 %v991_v39 }
 0xbc2   :  { %v1711_v41 = vpop.eup %1710 }
 0xbc3   :  { %v993_v43 = vmul.f32 %v1711_v41, %v982_v42 }
 0xbc5   :  { %v1013_v44 = vrot.slane %v993_v43, 1 }
 0xbc7   :  { %v1028_v45 = vsel %vm1027_vm8, %v2269_v22, %v1013_v44 }
 0xbc8   :  { %1634 = vmatmul.mubr.f32.vlgmr.msra.gmra.mxu1 %v1028_v45 }
 0xc88   :  { %v1118_v46 = vpop.f32.mrf.mxu1 }
 0xc89   :  { %v1119_v47 = vadd.f32 %v1156_v0, %v1118_v46 }
 0xc8a   :  { %v1635_v48 = vpop.f32.mrf.mxu1 }
 0xc8b   :  { %v1157_v49 = vmul.f32 -1.442695, %v1119_v47 }
 0xc8d   :  { %1712 = vpow2.f32 %v1157_v49 }
 0xc9a   :  { %v1713_v50 = vpop.eup %1712 }
 0xc9b   :  { %v1125_v51 = vadd.f32 1.0, %v1713_v50 }
 0xc9d   :  { %1714 = vrcp.f32 %v1125_v51 }
 0xcaa   :  { %v1715_v52 = vpop.eup %1714 }
 0xcab   :  { %1128 = vst [vmem:[#allocation10] sm:$0xff] %v1715_v52 }
 0xcac   :  { %1807 = shalt.err (!%p1804_p10)
}
 0xcad   :  { %1138 = dma.vmem_to_hbm [thread:$0]  %s1136_s22, 128, %s2304_s6, [#allocation4]  }
 0xcae   :  { %1822 = dma.done.wait [#allocation4], 128  }
 0xcaf   :  { %1823 = vsyncadd [#allocation4], 4294967168 }
 0xcb0   :  { %1142 = vsyncpa [#allocation3], 1 }
 0xcb1   :  { %1143 = vsyncpa [#allocation6], 1 }
 0xcb2   :  { %1144 = vsyncpa [#allocation9], 1 }
 0xcb3   :  { %1145 = vsyncpa [#allocation4], 1 }

</bundles_post_ra>
